<compile_context>
chip_gen: v6e
topology: v6e:2x2x1
jax: 0.10.0
libtpu: 0.0.40
codegen_flags: <defaults>
</compile_context>

<pallas_src>
import functools

import jax
import jax.numpy as jnp
from jax.experimental import pallas as pl
from jax.experimental.pallas import tpu as pltpu

_MIB = 1024 * 1024


def _round_up(x: int, m: int) -> int:
    return ((x + m - 1) // m) * m


def _cdiv(a: int, b: int) -> int:
    return (a + b - 1) // b


@functools.lru_cache(maxsize=1)
def _tpu_hw():
    """Best-effort (per-core VMEM bytes, #TensorCores); safe fallbacks."""
    vmem, cores = 128 * _MIB, 1
    try:
        info = pltpu.get_tpu_info()
        for name in ("vmem_capacity_bytes", "vmem_bytes", "vmem_size_bytes"):
            v = getattr(info, name, None)
            if v:
                vmem = int(v)
                break
        for name in ("num_tensorcores", "tensorcores_per_chip", "num_cores"):
            c = getattr(info, name, None)
            if c:
                cores = int(c)
                break
    except Exception:
        pass
    # v7x heuristic: the 64 MiB-per-core VMEM generation has 2 TensorCores/chip.
    if cores == 1 and vmem <= 64 * _MIB:
        cores = 2
    return vmem, cores


def _vmem_need(bm, bn, d_in, h_dim, cd_size, out_size):
    """Conservative VMEM working-set estimate (2x = double-buffered BlockSpecs)."""
    return (2 * bm * d_in * cd_size          # x batch tile
            + 2 * d_in * h_dim * cd_size     # W1 (resident)
            + 2 * h_dim * 4                  # b1 (f32)
            + 2 * h_dim * bn * cd_size       # W2 tile
            + 2 * bn * 4                     # b2 (f32)
            + 2 * bm * bn * out_size         # output tile
            + bm * h_dim * cd_size)          # cached layer-1 activation scratch


def _mlp_kernel(x_ref, w1_ref, b1_ref, w2_ref, b2_ref, o_ref, h_ref):
    # Layer 1 runs once per batch tile (first j iteration) and is cached in VMEM.
    @pl.when(pl.program_id(1) == 0)
    def _():
        h = jnp.dot(x_ref[...], w1_ref[...], preferred_element_type=jnp.float32)
        h = jnp.maximum(h + b1_ref[...], 0.0)          # bias + ReLU in f32 (VPU)
        h_ref[...] = h.astype(h_ref.dtype)
    # Layer 2: (bm, H) @ (H, bn) — one lane-dense output-N tile, f32 accumulation.
    y = jnp.dot(h_ref[...], w2_ref[...], preferred_element_type=jnp.float32)
    y = jnp.maximum(y + b2_ref[...], 0.0)
    o_ref[...] = y.astype(o_ref.dtype)


@functools.partial(jax.jit,
                   static_argnames=("block_m", "block_n", "compute_dtype"))
def adversary_encoder_forward(x, w1, b1, w2, b2, *, block_m=512, block_n=512,
                              compute_dtype=jnp.bfloat16):
    """x: (B, input_dim). Returns (B, hidden_dim) in x.dtype.

    Matmuls run on the MXU in `compute_dtype` (bf16 by default) with f32
    accumulation; bias-add and ReLU stay in f32. Pass weights through
    prepare_params() so they are cast to `compute_dtype` once, not per call.
    """
    B, D_in = x.shape
    H = w1.shape[1]
    out_dtype = x.dtype
    cd_size = jnp.dtype(compute_dtype).itemsize
    out_size = jnp.dtype(out_dtype).itemsize

    vmem_cap, cores = _tpu_hw()
    # ~100 MiB on v5e/v6e (128 MiB physical), ~48 MiB on v7x (64 MiB physical).
    budget = int(min(vmem_cap - 16 * _MIB, int(vmem_cap * 0.80)))

    # ---- batch (M) tile: MXU-aligned, big; tiny batches stay small ----
    m_align = 16 if (cd_size < 4 and B >= 16) else 8
    if B < 128:
        bm = _round_up(B, m_align)
    else:
        bm = min(_round_up(block_m, 128), _round_up(B, 128))
    # Feed every TensorCore (v7x has 2): force >= `cores` batch tiles when B allows.
    if cores > 1 and B >= 128 * cores and _cdiv(B, bm) < cores:
        bm = max(128, _round_up(_cdiv(B, cores), 128))

    # ---- output (N) tile: prefer W2 fully resident; lane-dense tiles as fallback ----
    cands = [H] + [c for c in (max(block_n, 128), 512, 256, 128)
                   if c < H and H % c == 0 and c % 128 == 0]
    cands = sorted(set(cands), reverse=True)
    bn = cands[-1]
    for c in cands:
        if _vmem_need(bm, c, D_in, H, cd_size, out_size) <= budget:
            bn = c
            break
    # Last resort: shrink the batch tile until the working set fits the budget.
    while _vmem_need(bm, bn, D_in, H, cd_size, out_size) > budget and bm > 128:
        bm = max(128, _round_up(bm // 2, 128))

    grid = (_cdiv(B, bm), H // bn)
    B_pad = grid[0] * bm

    # Inputs: pad the (cheap, narrow) x so its reads are in-bounds. Weights are
    # expected pre-cast; the astype below is a no-op in that case.
    xc = x.astype(compute_dtype)
    if B_pad != B:
        xc = jnp.pad(xc, ((0, B_pad - B), (0, 0)))
    w1c = w1.astype(compute_dtype)
    w2c = w2.astype(compute_dtype)
    b1f = b1.reshape(1, H).astype(jnp.float32)
    b2f = b2.reshape(1, H).astype(jnp.float32)

    # W2 is re-DMA'd once per batch tile only when the N axis is actually tiled.
    w2_reads = 1 if grid[1] == 1 else grid[0]
    cost = pl.CostEstimate(
        flops=2 * B_pad * (D_in * H + H * H),
        transcendentals=0,
        bytes_accessed=(xc.size * cd_size
                        + D_in * H * cd_size
                        + w2_reads * H * H * cd_size
                        + H * 4 + w2_reads * H * 4
                        + B * H * out_size),
    )

    out = pl.pallas_call(
        _mlp_kernel,
        out_shape=jax.ShapeDtypeStruct((B, H), out_dtype),
        grid_spec=pltpu.PrefetchScalarGridSpec(
            num_scalar_prefetch=0,
            grid=grid,
            in_specs=[
                pl.BlockSpec((bm, D_in), lambda i, j: (i, 0)),   # x batch tile
                pl.BlockSpec((D_in, H), lambda i, j: (0, 0)),    # W1 (resident)
                pl.BlockSpec((1, H), lambda i, j: (0, 0)),       # b1 (resident)
                pl.BlockSpec((H, bn), lambda i, j: (0, j)),      # W2 (resident or N-tiled)
                pl.BlockSpec((1, bn), lambda i, j: (0, j)),      # b2
            ],
            out_specs=pl.BlockSpec((bm, bn), lambda i, j: (i, j)),
            scratch_shapes=[pltpu.VMEM((bm, H), compute_dtype)],  # cached layer-1 act
        ),
        compiler_params=pltpu.CompilerParams(
            dimension_semantics=("parallel", "arbitrary"),
            vmem_limit_bytes=budget,
        ),
        cost_estimate=cost,
    )(xc, w1c, b1f, w2c, b2f)
    return out


def prepare_params(w1, b1, w2, b2, compute_dtype=jnp.bfloat16):
    """One-time weight cast to the MXU compute dtype (biases stay f32)."""
    H = w1.shape[1]
    return (jnp.asarray(w1, compute_dtype),
            jnp.asarray(b1, jnp.float32).reshape(1, H),
            jnp.asarray(w2, compute_dtype),
            jnp.asarray(b2, jnp.float32).reshape(1, H))


def init_params(key, input_dim, hidden_dim, dtype=jnp.float32):
    """Deterministic init mimicking nn.Linear's Kaiming-uniform default."""
    k1, k2, k3, k4 = jax.random.split(key, 4)
    bound1 = 1.0 / jnp.sqrt(input_dim)
    bound2 = 1.0 / jnp.sqrt(hidden_dim)
    # Stored already-transposed: (in_features, out_features).
    w1 = jax.random.uniform(k1, (input_dim, hidden_dim), dtype, -bound1, bound1)
    b1 = jax.random.uniform(k2, (1, hidden_dim), dtype, -bound1, bound1)
    w2 = jax.random.uniform(k3, (hidden_dim, hidden_dim), dtype, -bound2, bound2)
    b2 = jax.random.uniform(k4, (1, hidden_dim), dtype, -bound2, bound2)
    return w1, b1, w2, b2


if __name__ == "__main__":
    input_dim, hidden_dim = 32, 128

    key = jax.random.PRNGKey(0)
    kx, kp, kx2 = jax.random.split(key, 3)
    w1, b1, w2, b2 = init_params(kp, input_dim, hidden_dim)

    # Pure-JAX references.
    def ref_f32(xv):
        return jnp.maximum(jnp.maximum(xv @ w1 + b1, 0.0) @ w2 + b2, 0.0)

    def ref_bf16(xv):
        cd = jnp.bfloat16
        h = jnp.dot(xv.astype(cd), w1.astype(cd),
                    preferred_element_type=jnp.float32) + b1
        h = jnp.maximum(h, 0.0)
        y = jnp.dot(h.astype(cd), w2.astype(cd),
                    preferred_element_type=jnp.float32) + b2
        return jnp.maximum(y, 0.0)

    # --- small batch, f32 compute path: strict check of forward semantics ---
    x = jax.random.normal(kx, (8, input_dim), jnp.float32)
    out32 = jax.block_until_ready(
        adversary_encoder_forward(x, w1, b1, w2, b2, compute_dtype=jnp.float32))
    assert out32.shape == (8, hidden_dim)
    assert jnp.allclose(out32, ref_f32(x), atol=1e-5, rtol=1e-5)

    # --- default bf16-into-MXU path with weights pre-cast once ---
    params_bf16 = prepare_params(w1, b1, w2, b2)
    out_bf = jax.block_until_ready(adversary_encoder_forward(x, *params_bf16))
    assert out_bf.shape == (8, hidden_dim)
    assert jnp.allclose(out_bf, ref_bf16(x), atol=5e-3, rtol=5e-3)
    assert jnp.allclose(out_bf, ref_f32(x), atol=1e-1, rtol=1e-1)  # semantics sanity

    # --- ragged batch: partial final batch tile, output written unpadded ---
    x2 = jax.random.normal(kx2, (300, input_dim), jnp.float32)
    out2 = jax.block_until_ready(adversary_encoder_forward(x2, *params_bf16))
    assert out2.shape == (300, hidden_dim)
    assert jnp.allclose(out2, ref_bf16(x2), atol=5e-3, rtol=5e-3)

    print("KERNEL_OK")
</pallas_src>

<mosaic_0001>
module attributes {stable_mosaic.version = 11 : i64} {
  func.func @_mlp_kernel(%arg0: i32, %arg1: i32, %arg2: memref<8x32xf32, #tpu.memory_space<vmem>>, %arg3: memref<32x128xf32, #tpu.memory_space<vmem>>, %arg4: memref<1x128xf32, #tpu.memory_space<vmem>>, %arg5: memref<128x128xf32, #tpu.memory_space<vmem>>, %arg6: memref<1x128xf32, #tpu.memory_space<vmem>>, %arg7: memref<8x128xf32, #tpu.memory_space<vmem>>, %arg8: memref<8x128xf32, #tpu.memory_space<vmem>>) attributes {dimension_semantics = [#tpu.dimension_semantics<parallel>, #tpu.dimension_semantics<arbitrary>], iteration_bounds = array<i64: 1, 1>, scalar_prefetch = 0 : i64, scratch_operands = 1 : i64, tpu.core_type = #tpu.core_type<tc>, window_params = [{transform_indices = @transform_0, window_bounds = array<i64: 8, 32>}, {pipeline_mode = #tpu.pipeline_mode<synchronous>, transform_indices = @transform_1, window_bounds = array<i64: 32, 128>}, {pipeline_mode = #tpu.pipeline_mode<synchronous>, transform_indices = @transform_2, window_bounds = array<i64: 1, 128>}, {transform_indices = @transform_3, window_bounds = array<i64: 128, 128>}, {transform_indices = @transform_4, window_bounds = array<i64: 1, 128>}, {transform_indices = @transform_5, window_bounds = array<i64: 8, 128>}]} {
    %c0_i32 = arith.constant 0 : i32
    %0 = arith.cmpi eq, %arg1, %c0_i32 : i32
    %1 = arith.extui %0 : i1 to i32
    %c0_i32_0 = arith.constant 0 : i32
    %2 = arith.cmpi ne, %1, %c0_i32_0 : i32
    scf.if %2 {
      %c0_9 = arith.constant 0 : index
      %c0_10 = arith.constant 0 : index
      %12 = vector.load %arg2[%c0_9, %c0_10] : memref<8x32xf32, #tpu.memory_space<vmem>>, vector<8x32xf32>
      %c0_11 = arith.constant 0 : index
      %c0_12 = arith.constant 0 : index
      %13 = vector.load %arg3[%c0_11, %c0_12] : memref<32x128xf32, #tpu.memory_space<vmem>>, vector<32x128xf32>
      %cst_13 = arith.constant dense<0.000000e+00> : vector<8x128xf32>
      %14 = tpu.matmul %12, %13, %cst_13 {dimension_numbers = #tpu.dot_dimension_numbers<[1], [0], [0], [1], [0, 0, 1, 1], [], []>} : vector<8x32xf32>, vector<32x128xf32>, vector<8x128xf32> -> vector<8x128xf32>
      %c0_14 = arith.constant 0 : index
      %c0_15 = arith.constant 0 : index
      %15 = vector.load %arg4[%c0_14, %c0_15] : memref<1x128xf32, #tpu.memory_space<vmem>>, vector<1x128xf32>
      %16 = vector.broadcast %15 : vector<1x128xf32> to vector<8x128xf32>
      %17 = arith.addf %14, %16 : vector<8x128xf32>
      %cst_16 = arith.constant 0.000000e+00 : f32
      %18 = vector.broadcast %cst_16 : f32 to vector<8x128xf32>
      %19 = arith.maximumf %17, %18 : vector<8x128xf32>
      %c0_17 = arith.constant 0 : index
      %c0_18 = arith.constant 0 : index
      %20 = vector.load %arg8[%c0_17, %c0_18] : memref<8x128xf32, #tpu.memory_space<vmem>>, vector<8x128xf32>
      tpu.vector_store %arg8[%c0_17, %c0_18], %19 {strides = array<i32>} : memref<8x128xf32, #tpu.memory_space<vmem>>, vector<8x128xf32>,
    } else {
    }
    %c0 = arith.constant 0 : index
    %c0_1 = arith.constant 0 : index
    %3 = vector.load %arg8[%c0, %c0_1] : memref<8x128xf32, #tpu.memory_space<vmem>>, vector<8x128xf32>
    %c0_2 = arith.constant 0 : index
    %c0_3 = arith.constant 0 : index
    %4 = vector.load %arg5[%c0_2, %c0_3] : memref<128x128xf32, #tpu.memory_space<vmem>>, vector<128x128xf32>
    %cst = arith.constant dense<0.000000e+00> : vector<8x128xf32>
    %5 = tpu.matmul %3, %4, %cst {dimension_numbers = #tpu.dot_dimension_numbers<[1], [0], [0], [1], [0, 0, 1, 1], [], []>} : vector<8x128xf32>, vector<128x128xf32>, vector<8x128xf32> -> vector<8x128xf32>
    %c0_4 = arith.constant 0 : index
    %c0_5 = arith.constant 0 : index
    %6 = vector.load %arg6[%c0_4, %c0_5] : memref<1x128xf32, #tpu.memory_space<vmem>>, vector<1x128xf32>
    %7 = vector.broadcast %6 : vector<1x128xf32> to vector<8x128xf32>
    %8 = arith.addf %5, %7 : vector<8x128xf32>
    %cst_6 = arith.constant 0.000000e+00 : f32
    %9 = vector.broadcast %cst_6 : f32 to vector<8x128xf32>
    %10 = arith.maximumf %8, %9 : vector<8x128xf32>
    %c0_7 = arith.constant 0 : index
    %c0_8 = arith.constant 0 : index
    %11 = vector.load %arg7[%c0_7, %c0_8] : memref<8x128xf32, #tpu.memory_space<vmem>>, vector<8x128xf32>
    tpu.vector_store %arg7[%c0_7, %c0_8], %10 {strides = array<i32>} : memref<8x128xf32, #tpu.memory_space<vmem>>, vector<8x128xf32>,
    return
  }
  func.func @transform_0(%arg0: i32, %arg1: i32) -> (i32, i32) {
    %c0_i32 = arith.constant 0 : i32
    %c0_i32_0 = arith.constant 0 : i32
    return %arg0, %c0_i32 : i32, i32
  }
  func.func @transform_1(%arg0: i32, %arg1: i32) -> (i32, i32) {
    %c0_i32 = arith.constant 0 : i32
    %c0_i32_0 = arith.constant 0 : i32
    %c0_i32_1 = arith.constant 0 : i32
    return %c0_i32, %c0_i32_0 : i32, i32
  }
  func.func @transform_2(%arg0: i32, %arg1: i32) -> (i32, i32) {
    %c0_i32 = arith.constant 0 : i32
    %c0_i32_0 = arith.constant 0 : i32
    %c0_i32_1 = arith.constant 0 : i32
    return %c0_i32, %c0_i32_0 : i32, i32
  }
  func.func @transform_3(%arg0: i32, %arg1: i32) -> (i32, i32) {
    %c0_i32 = arith.constant 0 : i32
    %c0_i32_0 = arith.constant 0 : i32
    return %c0_i32, %arg1 : i32, i32
  }
  func.func @transform_4(%arg0: i32, %arg1: i32) -> (i32, i32) {
    %c0_i32 = arith.constant 0 : i32
    %c0_i32_0 = arith.constant 0 : i32
    return %c0_i32, %arg1 : i32, i32
  }
  func.func @transform_5(%arg0: i32, %arg1: i32) -> (i32, i32) {
    %c0_i32 = arith.constant 0 : i32
    return %arg0, %arg1 : i32, i32
  }
}

</mosaic_0001>

<bundles_post_ra>
// kernel: adversary_encoder_forward.1
= control target key start
LH: loop header
LB: loop body
LE: loop exit
PB: predicated region body
PF: predicated region fallthrough
CT: control target
= control target key end

     0   :  { %10 = vsyncpa [#allocation4], 0  ;;  %s507_s0 = inlined_call_operand.hbm [shape: f32[8,32], index: 0, kind: input, shape index: {}]   ;;  %s508_s1 = inlined_call_operand.hbm [shape: f32[32,128], index: 1, kind: input, shape index: {}]   ;;  %s509_s2 = inlined_call_operand.vmem [shape: f32[1,128], index: 2, kind: input, shape index: {}]   ;;  %s510_s3 = inlined_call_operand.hbm [shape: f32[128,128], index: 3, kind: input, shape index: {}]   ;;  %s511_s4 = inlined_call_operand.vmem [shape: f32[1,128], index: 4, kind: input, shape index: {}]   ;;  %s512_s5 = inlined_call_operand.hbm [shape: f32[8,128], index: 5, kind: output, shape index: {}]  }
   0x1   :  { %11 = vsyncpa [#allocation7], 0 }
   0x2   :  { %12 = vsyncpa [#allocation5], 0  ;;  %s429_s18 = smov [#allocation6]  }
   0x3   :  { %s28_s19 = sshll.u32 %s429_s18, 4  ;;  %s29_s19 = int_to_ptr.vmem [resolvable:$true] %s28_s19 }
   0x4   :  { %s351_s20 = scalar_lea.vmem %s29_s19, 512  ;;  %p356_p1 = scmp.lt.s32.totalorder %s29_s19, %s29_s19 }
   0x5   :  { %p352_p0 = scmp.ne.s32.totalorder %s29_s19, %s351_s20  ;;  %p357_p2 = scmp.lt.s32.totalorder %s351_s20, %s351_s20 }
   0x7   :  { %p358_p3 = por %p357_p2, %p356_p1 }
   0x9   :  { %p359_p4 = pnand %p358_p3, %p352_p0 }
   0xb   :  { %362 = shalt.err (!%p359_p4)
}
   0xc   :  { %s430_s21 = smov 128   ;;  %s431_s22 = smov 8  }
   0xd   :  { %34 = dma.hbm_to_vmem [thread:$0]  %s508_s1, 512, %s29_s19, [#allocation7], %s430_s21, %s430_s21, %s431_s22  }
   0xe   :  { %s432_s25 = smov [#allocation3]   ;;  %s433_s27 = smov [#allocation8]  }
   0xf   :  { %s19_s26 = sshll.u32 %s432_s25, 4  ;;  %s42_s28 = sshll.u32 %s433_s27, 4  ;;  %s20_s26 = int_to_ptr.vmem [resolvable:$true] %s19_s26  ;;  %s43_s28 = int_to_ptr.vmem [resolvable:$true] %s42_s28 }
  0x10   :  { %s371_s29 = scalar_lea.vmem %s20_s26, 128  ;;  %p376_p6 = scmp.lt.s32.totalorder %s20_s26, %s20_s26 }
  0x11   :  { %p372_p5 = scmp.ne.s32.totalorder %s20_s26, %s371_s29  ;;  %p377_p7 = scmp.lt.s32.totalorder %s371_s29, %s371_s29 }
  0x13   :  { %p378_p8 = por %p377_p7, %p376_p6 }
  0x15   :  { %p379_p9 = pnand %p378_p8, %p372_p5 }
  0x17   :  { %382 = shalt.err (!%p379_p9)
}
  0x18   :  { %22 = dma.hbm_to_vmem [thread:$0]  %s507_s0, 128, %s20_s26, [#allocation4]  }
  0x19   :  { %s391_s7 = scalar_lea.vmem %s43_s28, 2048  ;;  %p396_p11 = scmp.lt.s32.totalorder %s43_s28, %s43_s28 }
  0x1a   :  { %p392_p10 = scmp.ne.s32.totalorder %s43_s28, %s391_s7  ;;  %p397_p12 = scmp.lt.s32.totalorder %s391_s7, %s391_s7 }
  0x1c   :  { %p398_p13 = por %p397_p12, %p396_p11 }
  0x1e   :  { %p399_p0 = pnand %p398_p13, %p392_p10 }
  0x20   :  { %402 = shalt.err (!%p399_p0)
}
  0x21   :  { %48 = dma.hbm_to_vmem [thread:$0]  %s510_s3, 2048, %s43_s28, [#allocation7], %s430_s21, %s430_s21, %s431_s22  }
  0x22   :  { %423 = dma.done.wait [#allocation4], 128  }
  0x23   :  { %424 = vsyncadd [#allocation4], 4294967168 }
  0x24   :  { %425 = dma.done.wait [#allocation7], 2560  }
  0x25   :  { %426 = vsyncadd [#allocation7], 4294964736  ;;  %v434_v0 = vmov 0.0   ;;  %vm435_vm0 = vmmov 0   ;;  %v68_v1 = vld [vmem:[#allocation6 + $0x18] sm:$0xff]  ;;  %v67_v2 = vld [vmem:[#allocation6 + $0x10] sm:$0xff] }
  0x26   :  { %289 = vmatprep.subr.mxu0 %v434_v0  ;;  %297 = vmatprep.mubr.msk.f32.mxu0 %vm435_vm0, %v434_v0  ;;  %v168_v3 = vld [vmem:[#allocation8 + $0x78] sm:$0xff]  ;;  %v66_v4 = vld [vmem:[#allocation6 + $0x8] sm:$0xff]  ;;  %v167_v5 = vld [vmem:[#allocation8 + $0x70] sm:$0xff]  ;;  %vm76_vm1 = vcmask 261120   ;;  %s436_s11 = smov [#allocation9]  }
  0x27   :  { %300 = vmatprep.subr.mxu1 %v434_v0  ;;  %332 = vmatprep.mubr.msk.f32.mxu1 %vm435_vm0, %v434_v0  ;;  %v166_v6 = vld [vmem:[#allocation8 + $0x68] sm:$0xff]  ;;  %v65_v7 = vld [vmem:[#allocation6] sm:$0xff]  ;;  %v64_v8 = vld [vmem:[#allocation3] sm:$0xff]  ;;  %s254_s12 = sshll.u32 %s436_s11, 4  ;;  %s255_s12 = int_to_ptr.vmem [resolvable:$true] %s254_s12 }
  0x28   :  { %290 = vmatpush3.msra.mxu0 %v68_v1  ;;  %301 = vmatpush3.msra.mxu1 %v168_v3  ;;  %v165_v9 = vld [vmem:[#allocation8 + $0x60] sm:$0xff]  ;;  %v164_v10 = vld [vmem:[#allocation8 + $0x58] sm:$0xff]  ;;  %v163_v11 = vld [vmem:[#allocation8 + $0x50] sm:$0xff]  ;;  %s403_s13 = scalar_lea.vmem %s255_s12, 128  ;;  %p408_p2 = scmp.lt.s32.totalorder %s255_s12, %s255_s12 }
  0x29   :  { %291 = vmatprep.subr.mxu0 %v434_v0  ;;  %302 = vmatprep.subr.mxu1 %v434_v0  ;;  %v162_v12 = vld [vmem:[#allocation8 + $0x48] sm:$0xff]  ;;  %v161_v13 = vld [vmem:[#allocation8 + $0x40] sm:$0xff]  ;;  %v160_v14 = vld [vmem:[#allocation8 + $0x38] sm:$0xff]  ;;  %p404_p1 = scmp.ne.s32.totalorder %s255_s12, %s403_s13  ;;  %p409_p3 = scmp.lt.s32.totalorder %s403_s13, %s403_s13 }
  0x2a   :  { %292 = vmatpush3.msra.mxu0 %v67_v2  ;;  %303 = vmatpush3.msra.mxu1 %v167_v5  ;;  %v159_v15 = vld [vmem:[#allocation8 + $0x30] sm:$0xff]  ;;  %v158_v16 = vld [vmem:[#allocation8 + $0x28] sm:$0xff]  ;;  %v157_v17 = vld [vmem:[#allocation8 + $0x20] sm:$0xff] }
  0x2b   :  { %293 = vmatprep.subr.mxu0 %v434_v0  ;;  %304 = vmatprep.subr.mxu1 %v434_v0  ;;  %v156_v18 = vld [vmem:[#allocation8 + $0x18] sm:$0xff]  ;;  %v155_v19 = vld [vmem:[#allocation8 + $0x10] sm:$0xff]  ;;  %v154_v20 = vld [vmem:[#allocation8 + $0x8] sm:$0xff]  ;;  %p410_p4 = por %p409_p3, %p408_p2 }
  0x2c   :  { %294 = vmatpush3.msra.mxu0 %v66_v4  ;;  %305 = vmatpush3.msra.mxu1 %v166_v6  ;;  %v153_v21 = vld [vmem:[#allocation8] sm:$0xff]  ;;  %v264_v22 = vld [vmem:[%s509_s2] ss:$0 sm:$0xff] }
  0x2d   :  { %295 = vmatprep.subr.mxu0 %v434_v0  ;;  %306 = vmatprep.subr.mxu1 %v434_v0  ;;  %v266_v27 = vld [vmem:[%s511_s4] ss:$0 sm:$0xff]  ;;  %p411_p5 = pnand %p410_p4, %p404_p1 }
  0x2e   :  { %296 = vmatpush3.msra.mxu0 %v65_v7  ;;  %307 = vmatpush3.msra.mxu1 %v165_v9 }
  0x2f   :  { %298 = vmatmul.mubr.msk.f32.vlgmr.msra.gmra.mxu0 %vm76_vm1, %v64_v8  ;;  %308 = vmatprep.subr.mxu1 %v434_v0 }
  0x30   :  { %309 = vmatpush3.msra.mxu1 %v164_v10 }
  0x31   :  { %310 = vmatprep.subr.mxu1 %v434_v0 }
  0x32   :  { %311 = vmatpush3.msra.mxu1 %v163_v11 }
  0x33   :  { %312 = vmatprep.subr.mxu1 %v434_v0 }
  0x34   :  { %313 = vmatpush3.msra.mxu1 %v162_v12 }
  0x35   :  { %314 = vmatprep.subr.mxu1 %v434_v0 }
  0x36   :  { %315 = vmatpush3.msra.mxu1 %v161_v13 }
  0x37   :  { %316 = vmatprep.subr.mxu1 %v434_v0 }
  0x38   :  { %317 = vmatpush3.msra.mxu1 %v160_v14 }
  0x39   :  { %318 = vmatprep.subr.mxu1 %v434_v0 }
  0x3a   :  { %319 = vmatpush3.msra.mxu1 %v159_v15 }
  0x3b   :  { %320 = vmatprep.subr.mxu1 %v434_v0 }
  0x3c   :  { %321 = vmatpush3.msra.mxu1 %v158_v16 }
  0x3d   :  { %322 = vmatprep.subr.mxu1 %v434_v0 }
  0x3e   :  { %323 = vmatpush3.msra.mxu1 %v157_v17 }
  0x3f   :  { %324 = vmatprep.subr.mxu1 %v434_v0 }
  0x40   :  { %325 = vmatpush3.msra.mxu1 %v156_v18 }
  0x41   :  { %326 = vmatprep.subr.mxu1 %v434_v0 }
  0x42   :  { %327 = vmatpush3.msra.mxu1 %v155_v19 }
  0x43   :  { %328 = vmatprep.subr.mxu1 %v434_v0 }
  0x44   :  { %329 = vmatpush3.msra.mxu1 %v154_v20 }
  0x45   :  { %330 = vmatprep.subr.mxu1 %v434_v0 }
  0x46   :  { %331 = vmatpush3.msra.mxu1 %v153_v21 }
  0xef   :  { %v146_v23 = vpop.f32.mrf.mxu0 }
  0xf0   :  { %v147_v24 = vadd.f32 %v264_v22, %v146_v23 }
  0xf1   :  { %v299_v25 = vpop.f32.mrf.mxu0 }
  0xf2   :  { %v150_v26 = vmax.f32 %v147_v24, 0.0 }
  0xf4   :  { %333 = vmatmul.mubr.f32.vlgmr.msra.gmra.mxu1 %v150_v26 }
 0x1b4   :  { %v242_v28 = vpop.f32.mrf.mxu1 }
 0x1b5   :  { %v243_v29 = vadd.f32 %v266_v27, %v242_v28 }
 0x1b6   :  { %v334_v30 = vpop.f32.mrf.mxu1 }
 0x1b7   :  { %v246_v31 = vmax.f32 %v243_v29, 0.0 }
 0x1b9   :  { %247 = vst [vmem:[#allocation9] sm:$0xff] %v246_v31 }
 0x1ba   :  { %414 = shalt.err (!%p411_p5)
}
 0x1bb   :  { %257 = dma.vmem_to_hbm [thread:$0]  %s255_s12, 128, %s512_s5, [#allocation5]  }
 0x1bc   :  { %427 = dma.done.wait [#allocation5], 128  }
 0x1bd   :  { %428 = vsyncadd [#allocation5], 4294967168 }
 0x1be   :  { %261 = vsyncpa [#allocation4], 1 }
 0x1bf   :  { %262 = vsyncpa [#allocation7], 1 }
 0x1c0   :  { %263 = vsyncpa [#allocation5], 1 }

</bundles_post_ra>
